<compile_context>
chip_gen: v6e
topology: v6e:2x2x1
jax: 0.10.0
libtpu: 0.0.40
codegen_flags: <defaults>
</compile_context>

<pallas_src>
import functools

import jax
import jax.numpy as jnp
from jax.experimental import pallas as pl
from jax.experimental.pallas import tpu as pltpu

_EPS = 1e-7
_LANE = 128       # boxes per lane row
_N_PLANES = 9     # 4 pred coords + 4 target coords + weight[:, 0]


def _giou_kernel(slab_ref, out_ref, *, approx_recip):
    # slab_ref: (9, TR, 128) f32 VMEM tile. Planes: pred x1,y1,x2,y2,
    #           target x1,y1,x2,y2, weight[:, 0].
    # out_ref : (1, 8, 128) f32 accumulator block, resident across the
    #           reduction ("arbitrary") grid axis for a fixed parallel index.
    i = pl.program_id(1)

    @pl.when(i == 0)
    def _():
        out_ref[...] = jnp.zeros_like(out_ref)

    px1 = slab_ref[0]
    py1 = slab_ref[1]
    px2 = slab_ref[2]
    py2 = slab_ref[3]
    tx1 = slab_ref[4]
    ty1 = slab_ref[5]
    tx2 = slab_ref[6]
    ty2 = slab_ref[7]
    w = slab_ref[8]                       # weight[:, 0]

    # intersection
    ix1 = jnp.maximum(px1, tx1)
    iy1 = jnp.maximum(py1, ty1)
    ix2 = jnp.minimum(px2, tx2)
    iy2 = jnp.minimum(py2, ty2)
    inter = jnp.maximum(ix2 - ix1, 0.0) * jnp.maximum(iy2 - iy1, 0.0)

    area_p = (px2 - px1) * (py2 - py1)
    area_t = (tx2 - tx1) * (ty2 - ty1)
    union = area_p + area_t - inter

    # smallest enclosing box
    cx1 = jnp.minimum(px1, tx1)
    cy1 = jnp.minimum(py1, ty1)
    cx2 = jnp.maximum(px2, tx2)
    cy2 = jnp.maximum(py2, ty2)
    area_c = (cx2 - cx1) * (cy2 - cy1)

    if approx_recip:
        # EUP reciprocals: free the VALU slots (mainly useful on v7x).
        iou = inter * pl.reciprocal(union + _EPS, approx=True)
        giou = iou - (area_c - union) * pl.reciprocal(area_c + _EPS, approx=True)
    else:
        iou = inter / (union + _EPS)
        giou = iou - (area_c - union) / (area_c + _EPS)

    lw = (1.0 - giou) * w                 # weighted per-box loss, (TR, 128)
    tr = lw.shape[0]                      # static, multiple of 8 by construction
    # Fold TR sublane-rows down to one (8, 128) vreg plane: pure VALU adds,
    # no cross-lane (XLU) work and no lane-sparse stores per step.
    out_ref[0] = out_ref[0] + lw.reshape(tr // 8, 8, _LANE).sum(axis=0)


def _num_tensorcores():
    """Best-effort TensorCores per chip: 2 on v7x, else 1 (v5e/v6e)."""
    # TODO(synk): verify in xprof that the "parallel" axis is actually sharded
    # across both v7x TensorCores; if not, switch axis 0 to pltpu.CORE_PARALLEL.
    try:
        kind = jax.devices()[0].device_kind.lower()
        if "v7" in kind:
            return 2
    except Exception:
        pass
    return 1


def giou_loss(pred, target, weight, loss_weight=1.0, avg_factor=None,
              *, max_rows_per_step=512, num_cores=None,
              approx_reciprocal=False):
    """pred, target, weight: (N, 4) arrays. Returns shape (1,) float32.

    Note: per mmdet-1.x semantics only weight[:, 0] multiplies the per-box
    loss; per-coordinate weights that differ within a box are not supported.
    """
    n = pred.shape[0]
    pred = jnp.asarray(pred, jnp.float32)
    target = jnp.asarray(target, jnp.float32)
    weight = jnp.asarray(weight, jnp.float32)

    ncores = _num_tensorcores() if num_cores is None else int(num_cores)
    ncores = max(1, ncores)
    max_rows = max(8, (int(max_rows_per_step) // 8) * 8)   # vreg-aligned

    rows = -(-n // _LANE)                    # sublane-rows of 128 boxes
    half = -(-rows // ncores)                # rows per parallel slice
    if half <= max_rows:
        tr = ((half + 7) // 8) * 8           # multiple of 8 (vreg aligned)
        steps = 1
    else:
        tr = max_rows
        steps = -(-half // max_rows)
    rows_pad = ncores * steps * tr
    n_pad = rows_pad * _LANE
    pad = n_pad - n

    # Single-materialisation layout prep: one concatenate of 9 padded columns
    # directly yields the (9, rows_pad, 128) plane slab (column slices and
    # pads fuse as producers of the concat). Padded boxes carry zero weight
    # -> contribute nothing; _EPS keeps the padded 0/0 from becoming NaN.
    cols = [pred[:, 0], pred[:, 1], pred[:, 2], pred[:, 3],
            target[:, 0], target[:, 1], target[:, 2], target[:, 3],
            weight[:, 0]]
    slab = jnp.concatenate([jnp.pad(c, (0, pad)) for c in cols])
    slab = slab.reshape(_N_PLANES, rows_pad, _LANE)

    # TODO(synk): optionally stream the slab as bf16 (halves HBM bytes) if
    # ~3-digit coordinate precision is acceptable for the training loss.

    block_bytes = _N_PLANES * tr * _LANE * 4
    vmem_limit = int(min(64 * 2**20, max(32 * 2**20, 3 * block_bytes + 2**21)))

    kernel = functools.partial(_giou_kernel, approx_recip=approx_reciprocal)

    out = pl.pallas_call(
        kernel,
        out_shape=jax.ShapeDtypeStruct((ncores, 8, _LANE), jnp.float32),
        grid_spec=pltpu.PrefetchScalarGridSpec(
            num_scalar_prefetch=0,
            grid=(ncores, steps),
            in_specs=[
                pl.BlockSpec((_N_PLANES, tr, _LANE),
                             lambda c, i: (0, c * steps + i, 0)),
            ],
            out_specs=pl.BlockSpec((1, 8, _LANE), lambda c, i: (c, 0, 0)),
        ),
        compiler_params=pltpu.CompilerParams(
            dimension_semantics=("parallel", "arbitrary"),
            vmem_limit_bytes=vmem_limit),
        cost_estimate=pl.CostEstimate(
            flops=30 * n_pad,
            transcendentals=(2 * n_pad if approx_reciprocal else 0),
            bytes_accessed=_N_PLANES * 4 * n_pad + ncores * 8 * _LANE * 4),
    )(slab)

    # Tiny final reductions (ncores*8*128 floats + (N,4) bool sum) in plain XLA.
    wsum = jnp.sum(out)
    if avg_factor is None:
        # TODO(synk): PyTorch computes avg_factor with .item() (host sync);
        # here it stays a traced device scalar, which is numerically identical.
        npos = jnp.sum(weight > 0.0).astype(jnp.float32)
        avg_factor = npos / 4.0 + 1e-6
    return (jnp.float32(loss_weight) * wsum / avg_factor)[None]


def _giou_loss_ref(pred, target, weight, loss_weight=1.0):
    pred = pred.astype(jnp.float32)
    target = target.astype(jnp.float32)
    weight = weight.astype(jnp.float32)
    ix1 = jnp.maximum(pred[:, 0], target[:, 0])
    iy1 = jnp.maximum(pred[:, 1], target[:, 1])
    ix2 = jnp.minimum(pred[:, 2], target[:, 2])
    iy2 = jnp.minimum(pred[:, 3], target[:, 3])
    inter = jnp.maximum(ix2 - ix1, 0.0) * jnp.maximum(iy2 - iy1, 0.0)
    ap = (pred[:, 2] - pred[:, 0]) * (pred[:, 3] - pred[:, 1])
    at = (target[:, 2] - target[:, 0]) * (target[:, 3] - target[:, 1])
    union = ap + at - inter
    iou = inter / (union + _EPS)
    cx1 = jnp.minimum(pred[:, 0], target[:, 0])
    cy1 = jnp.minimum(pred[:, 1], target[:, 1])
    cx2 = jnp.maximum(pred[:, 2], target[:, 2])
    cy2 = jnp.maximum(pred[:, 3], target[:, 3])
    area_c = (cx2 - cx1) * (cy2 - cy1)
    giou = iou - (area_c - union) / (area_c + _EPS)
    loss = 1.0 - giou
    avg_factor = jnp.sum(weight > 0).astype(jnp.float32) / 4.0 + 1e-6
    return (loss_weight * jnp.sum(loss * weight[:, 0]) / avg_factor)[None]


if __name__ == "__main__":
    key = jax.random.PRNGKey(0)
    k1, k2, k3, k4, k5, k6 = jax.random.split(key, 6)

    def rand_boxes(k, n):
        xy = jax.random.uniform(k, (n, 2), minval=0.0, maxval=50.0)
        wh = jax.random.uniform(jax.random.fold_in(k, 1), (n, 2),
                                minval=1.0, maxval=20.0)
        return jnp.concatenate([xy, xy + wh], axis=-1)   # (n, 4) xyxy

    # --- small case: default tiling (single grid step) -----------------------
    N = 200
    pred = rand_boxes(k1, N)
    target = rand_boxes(k2, N)
    pos = (jax.random.uniform(k3, (N,)) > 0.3).astype(jnp.float32)
    weight = jnp.tile(pos[:, None], (1, 4))              # (N, 4) bbox weights

    ref = _giou_loss_ref(pred, target, weight, loss_weight=1.0)

    loss = giou_loss(pred, target, weight, loss_weight=1.0)
    jax.block_until_ready(loss)
    assert loss.shape == (1,)
    assert jnp.allclose(loss, ref, rtol=1e-5, atol=1e-5), (loss, ref)

    # --- multi-step reduction + explicit 2-way core axis ---------------------
    N2 = 3000
    pred2 = rand_boxes(k4, N2)
    target2 = rand_boxes(k5, N2)
    pos2 = (jax.random.uniform(k6, (N2,)) > 0.3).astype(jnp.float32)
    weight2 = jnp.tile(pos2[:, None], (1, 4))
    ref2 = _giou_loss_ref(pred2, target2, weight2, loss_weight=1.0)

    loss2 = giou_loss(pred2, target2, weight2, loss_weight=1.0,
                      max_rows_per_step=8, num_cores=2)
    jax.block_until_ready(loss2)
    assert jnp.allclose(loss2, ref2, rtol=1e-4, atol=1e-4), (loss2, ref2)

    # --- approximate-reciprocal (EUP) path: looser tolerance by design -------
    loss3 = giou_loss(pred, target, weight, loss_weight=1.0,
                      approx_reciprocal=True)
    jax.block_until_ready(loss3)
    assert jnp.allclose(loss3, ref, rtol=5e-2, atol=5e-2), (loss3, ref)

    print("KERNEL_OK")
</pallas_src>

<mosaic_0001>
module attributes {stable_mosaic.version = 11 : i64} {
  func.func @_giou_kernel(%arg0: i32, %arg1: i32, %arg2: memref<9x8x128xf32, #tpu.memory_space<vmem>>, %arg3: memref<1x8x128xf32, #tpu.memory_space<vmem>>) attributes {dimension_semantics = [#tpu.dimension_semantics<parallel>, #tpu.dimension_semantics<arbitrary>], iteration_bounds = array<i64: 1, 1>, scalar_prefetch = 0 : i64, scratch_operands = 0 : i64, tpu.core_type = #tpu.core_type<tc>, window_params = [{transform_indices = @transform_0, window_bounds = array<i64: 9, 8, 128>}, {transform_indices = @transform_1, window_bounds = array<i64: 1, 8, 128>}]} {
    %c0_i32 = arith.constant 0 : i32
    %0 = arith.cmpi eq, %arg1, %c0_i32 : i32
    %1 = arith.extui %0 : i1 to i32
    %c0_i32_0 = arith.constant 0 : i32
    %2 = arith.cmpi ne, %1, %c0_i32_0 : i32
    scf.if %2 {
      %cst_30 = arith.constant 0.000000e+00 : f32
      %66 = vector.broadcast %cst_30 : f32 to vector<1x8x128xf32>
      %c0_31 = arith.constant 0 : index
      %c0_32 = arith.constant 0 : index
      %c0_33 = arith.constant 0 : index
      %67 = vector.load %arg3[%c0_31, %c0_32, %c0_33] : memref<1x8x128xf32, #tpu.memory_space<vmem>>, vector<1x8x128xf32>
      tpu.vector_store %arg3[%c0_31, %c0_32, %c0_33], %66 {strides = array<i32>} : memref<1x8x128xf32, #tpu.memory_space<vmem>>, vector<1x8x128xf32>,
    } else {
    }
    %c0 = arith.constant 0 : index
    %c0_1 = arith.constant 0 : index
    %c0_2 = arith.constant 0 : index
    %3 = vector.load %arg2[%c0, %c0_1, %c0_2] : memref<9x8x128xf32, #tpu.memory_space<vmem>>, vector<1x8x128xf32>
    %4 = vector.shape_cast %3 : vector<1x8x128xf32> to vector<8x128xf32>
    %c1 = arith.constant 1 : index
    %c0_3 = arith.constant 0 : index
    %c0_4 = arith.constant 0 : index
    %5 = vector.load %arg2[%c1, %c0_3, %c0_4] : memref<9x8x128xf32, #tpu.memory_space<vmem>>, vector<1x8x128xf32>
    %6 = vector.shape_cast %5 : vector<1x8x128xf32> to vector<8x128xf32>
    %c2 = arith.constant 2 : index
    %c0_5 = arith.constant 0 : index
    %c0_6 = arith.constant 0 : index
    %7 = vector.load %arg2[%c2, %c0_5, %c0_6] : memref<9x8x128xf32, #tpu.memory_space<vmem>>, vector<1x8x128xf32>
    %8 = vector.shape_cast %7 : vector<1x8x128xf32> to vector<8x128xf32>
    %c3 = arith.constant 3 : index
    %c0_7 = arith.constant 0 : index
    %c0_8 = arith.constant 0 : index
    %9 = vector.load %arg2[%c3, %c0_7, %c0_8] : memref<9x8x128xf32, #tpu.memory_space<vmem>>, vector<1x8x128xf32>
    %10 = vector.shape_cast %9 : vector<1x8x128xf32> to vector<8x128xf32>
    %c4 = arith.constant 4 : index
    %c0_9 = arith.constant 0 : index
    %c0_10 = arith.constant 0 : index
    %11 = vector.load %arg2[%c4, %c0_9, %c0_10] : memref<9x8x128xf32, #tpu.memory_space<vmem>>, vector<1x8x128xf32>
    %12 = vector.shape_cast %11 : vector<1x8x128xf32> to vector<8x128xf32>
    %c5 = arith.constant 5 : index
    %c0_11 = arith.constant 0 : index
    %c0_12 = arith.constant 0 : index
    %13 = vector.load %arg2[%c5, %c0_11, %c0_12] : memref<9x8x128xf32, #tpu.memory_space<vmem>>, vector<1x8x128xf32>
    %14 = vector.shape_cast %13 : vector<1x8x128xf32> to vector<8x128xf32>
    %c6 = arith.constant 6 : index
    %c0_13 = arith.constant 0 : index
    %c0_14 = arith.constant 0 : index
    %15 = vector.load %arg2[%c6, %c0_13, %c0_14] : memref<9x8x128xf32, #tpu.memory_space<vmem>>, vector<1x8x128xf32>
    %16 = vector.shape_cast %15 : vector<1x8x128xf32> to vector<8x128xf32>
    %c7 = arith.constant 7 : index
    %c0_15 = arith.constant 0 : index
    %c0_16 = arith.constant 0 : index
    %17 = vector.load %arg2[%c7, %c0_15, %c0_16] : memref<9x8x128xf32, #tpu.memory_space<vmem>>, vector<1x8x128xf32>
    %18 = vector.shape_cast %17 : vector<1x8x128xf32> to vector<8x128xf32>
    %c8 = arith.constant 8 : index
    %c0_17 = arith.constant 0 : index
    %c0_18 = arith.constant 0 : index
    %19 = vector.load %arg2[%c8, %c0_17, %c0_18] : memref<9x8x128xf32, #tpu.memory_space<vmem>>, vector<1x8x128xf32>
    %20 = vector.shape_cast %19 : vector<1x8x128xf32> to vector<8x128xf32>
    %21 = arith.maximumf %4, %12 : vector<8x128xf32>
    %22 = arith.maximumf %6, %14 : vector<8x128xf32>
    %23 = arith.minimumf %8, %16 : vector<8x128xf32>
    %24 = arith.minimumf %10, %18 : vector<8x128xf32>
    %25 = arith.subf %23, %21 : vector<8x128xf32>
    %cst = arith.constant 0.000000e+00 : f32
    %26 = vector.broadcast %cst : f32 to vector<8x128xf32>
    %27 = arith.maximumf %25, %26 : vector<8x128xf32>
    %28 = arith.subf %24, %22 : vector<8x128xf32>
    %cst_19 = arith.constant 0.000000e+00 : f32
    %29 = vector.broadcast %cst_19 : f32 to vector<8x128xf32>
    %30 = arith.maximumf %28, %29 : vector<8x128xf32>
    %31 = arith.mulf %27, %30 : vector<8x128xf32>
    %32 = arith.subf %8, %4 : vector<8x128xf32>
    %33 = arith.subf %10, %6 : vector<8x128xf32>
    %34 = arith.mulf %32, %33 : vector<8x128xf32>
    %35 = arith.subf %16, %12 : vector<8x128xf32>
    %36 = arith.subf %18, %14 : vector<8x128xf32>
    %37 = arith.mulf %35, %36 : vector<8x128xf32>
    %38 = arith.addf %34, %37 : vector<8x128xf32>
    %39 = arith.subf %38, %31 : vector<8x128xf32>
    %40 = arith.minimumf %4, %12 : vector<8x128xf32>
    %41 = arith.minimumf %6, %14 : vector<8x128xf32>
    %42 = arith.maximumf %8, %16 : vector<8x128xf32>
    %43 = arith.maximumf %10, %18 : vector<8x128xf32>
    %44 = arith.subf %42, %40 : vector<8x128xf32>
    %45 = arith.subf %43, %41 : vector<8x128xf32>
    %46 = arith.mulf %44, %45 : vector<8x128xf32>
    %cst_20 = arith.constant 1.000000e-07 : f32
    %47 = vector.broadcast %cst_20 : f32 to vector<8x128xf32>
    %48 = arith.addf %39, %47 : vector<8x128xf32>
    %49 = arith.divf %31, %48 : vector<8x128xf32>
    %50 = arith.subf %46, %39 : vector<8x128xf32>
    %cst_21 = arith.constant 1.000000e-07 : f32
    %51 = vector.broadcast %cst_21 : f32 to vector<8x128xf32>
    %52 = arith.addf %46, %51 : vector<8x128xf32>
    %53 = arith.divf %50, %52 : vector<8x128xf32>
    %54 = arith.subf %49, %53 : vector<8x128xf32>
    %cst_22 = arith.constant 1.000000e+00 : f32
    %55 = vector.broadcast %cst_22 : f32 to vector<8x128xf32>
    %56 = arith.subf %55, %54 : vector<8x128xf32>
    %57 = arith.mulf %56, %20 : vector<8x128xf32>
    %c0_23 = arith.constant 0 : index
    %c0_24 = arith.constant 0 : index
    %c0_25 = arith.constant 0 : index
    %58 = vector.load %arg3[%c0_23, %c0_24, %c0_25] : memref<1x8x128xf32, #tpu.memory_space<vmem>>, vector<1x8x128xf32>
    %59 = vector.shape_cast %58 : vector<1x8x128xf32> to vector<8x128xf32>
    %60 = vector.shape_cast %57 : vector<8x128xf32> to vector<1x8x128xf32>
    %cst_26 = arith.constant dense<0.000000e+00> : vector<8x128xf32>
    %61 = vector.multi_reduction <add>, %60, %cst_26 [0] : vector<1x8x128xf32> to vector<8x128xf32>
    %62 = arith.addf %59, %61 : vector<8x128xf32>
    %c0_27 = arith.constant 0 : index
    %c0_28 = arith.constant 0 : index
    %c0_29 = arith.constant 0 : index
    %63 = vector.load %arg3[%c0_27, %c0_28, %c0_29] : memref<1x8x128xf32, #tpu.memory_space<vmem>>, vector<1x8x128xf32>
    %64 = vector.shape_cast %63 : vector<1x8x128xf32> to vector<8x128xf32>
    %65 = vector.shape_cast %62 : vector<8x128xf32> to vector<1x8x128xf32>
    tpu.vector_store %arg3[%c0_27, %c0_28, %c0_29], %65 {strides = array<i32>} : memref<1x8x128xf32, #tpu.memory_space<vmem>>, vector<1x8x128xf32>,
    return
  }
  func.func @transform_0(%arg0: i32, %arg1: i32) -> (i32, i32, i32) {
    %c1_i32 = arith.constant 1 : i32
    %0 = arith.muli %arg0, %c1_i32 : i32
    %1 = arith.addi %0, %arg1 : i32
    %c0_i32 = arith.constant 0 : i32
    %c0_i32_0 = arith.constant 0 : i32
    %c0_i32_1 = arith.constant 0 : i32
    return %c0_i32, %1, %c0_i32_0 : i32, i32, i32
  }
  func.func @transform_1(%arg0: i32, %arg1: i32) -> (i32, i32, i32) {
    %c0_i32 = arith.constant 0 : i32
    %c0_i32_0 = arith.constant 0 : i32
    %c0_i32_1 = arith.constant 0 : i32
    return %arg0, %c0_i32, %c0_i32_0 : i32, i32, i32
  }
}

</mosaic_0001>

<bundles_post_ra>
// kernel: tpu_custom_call.1
= control target key start
LH: loop header
LB: loop body
LE: loop exit
PB: predicated region body
PF: predicated region fallthrough
CT: control target
= control target key end

     0   :  { %6 = vsyncpa [#allocation3], 0  ;;  %s175_s0 = inlined_call_operand.hbm [shape: f32[9,8,128], index: 0, kind: input, shape index: {}]   ;;  %s176_s1 = inlined_call_operand.hbm [shape: f32[1,8,128], index: 1, kind: output, shape index: {}]  }
   0x1   :  { %7 = vsyncpa [#allocation4], 0  ;;  %s155_s6 = smov [#allocation2]  }
   0x2   :  { %s16_s7 = sshll.u32 %s155_s6, 4  ;;  %s17_s7 = int_to_ptr.vmem [resolvable:$true] %s16_s7 }
   0x3   :  { %s119_s8 = scalar_lea.vmem %s17_s7, 1152  ;;  %p124_p1 = scmp.lt.s32.totalorder %s17_s7, %s17_s7 }
   0x4   :  { %p120_p0 = scmp.ne.s32.totalorder %s17_s7, %s119_s8  ;;  %p125_p2 = scmp.lt.s32.totalorder %s119_s8, %s119_s8 }
   0x6   :  { %p126_p3 = por %p125_p2, %p124_p1 }
   0x8   :  { %p127_p4 = pnand %p126_p3, %p120_p0 }
   0xa   :  { %130 = shalt.err (!%p127_p4)
}
   0xb   :  { %s156_s9 = smov 128   ;;  %s157_s10 = smov 8  }
   0xc   :  { %22 = dma.hbm_to_vmem [thread:$0]  %s175_s0, 1152, %s17_s7, [#allocation3], %s156_s9, %s156_s9, %s157_s10  }
   0xd   :  { %151 = dma.done.wait [#allocation3], 1152  }
   0xe   :  { %152 = vsyncadd [#allocation3], 4294966144  ;;  %v32_v0 = vld [vmem:[#allocation2] sm:$0xff]  ;;  %v34_v1 = vld [vmem:[#allocation2 + $0x8] sm:$0xff]  ;;  %s158_s0 = smov [#allocation5]  }
   0xf   :  { %v36_v2 = vld [vmem:[#allocation2 + $0x10] sm:$0xff]  ;;  %v38_v3 = vld [vmem:[#allocation2 + $0x18] sm:$0xff]  ;;  %v40_v4 = vld [vmem:[#allocation2 + $0x20] sm:$0xff]  ;;  %s93_s13 = sshll.u32 %s158_s0, 4  ;;  %s94_s13 = int_to_ptr.vmem [resolvable:$true] %s93_s13 }
  0x10   :  { %v42_v5 = vld [vmem:[#allocation2 + $0x28] sm:$0xff]  ;;  %v58_v6 = vsub.f32 %v36_v2, %v32_v0  ;;  %v44_v7 = vld [vmem:[#allocation2 + $0x30] sm:$0xff]  ;;  %v46_v8 = vld [vmem:[#allocation2 + $0x38] sm:$0xff]  ;;  %v49_v9 = vmax.f32 %v32_v0, %v40_v4  ;;  %v59_v11 = vsub.f32 %v38_v3, %v34_v1  ;;  %v66_v12 = vmin.f32 %v32_v0, %v40_v4  ;;  %s131_s14 = scalar_lea.vmem %s94_s13, 128  ;;  %p136_p6 = scmp.lt.s32.totalorder %s94_s13, %s94_s13 }
  0x11   :  { %v50_v10 = vmax.f32 %v34_v1, %v42_v5  ;;  %v51_v13 = vmin.f32 %v36_v2, %v44_v7  ;;  %v52_v14 = vmin.f32 %v38_v3, %v46_v8  ;;  %v61_v15 = vsub.f32 %v44_v7, %v40_v4  ;;  %v48_v40 = vld [vmem:[#allocation2 + $0x40] sm:$0xff]  ;;  %p132_p5 = scmp.ne.s32.totalorder %s94_s13, %s131_s14  ;;  %p137_p7 = scmp.lt.s32.totalorder %s131_s14, %s131_s14 }
  0x12   :  { %v62_v16 = vsub.f32 %v46_v8, %v42_v5  ;;  %v60_v17 = vmul.f32 %v59_v11, %v58_v6  ;;  %v67_v18 = vmin.f32 %v34_v1, %v42_v5  ;;  %v68_v19 = vmax.f32 %v36_v2, %v44_v7 }
  0x13   :  { %v69_v20 = vmax.f32 %v38_v3, %v46_v8  ;;  %v53_v21 = vsub.f32 %v51_v13, %v49_v9  ;;  %v55_v22 = vsub.f32 %v52_v14, %v50_v10  ;;  %p138_p8 = por %p137_p7, %p136_p6 }
  0x14   :  { %v63_v23 = vmul.f32 %v62_v16, %v61_v15  ;;  %v70_v24 = vsub.f32 %v68_v19, %v66_v12 }
  0x15   :  { %v71_v25 = vsub.f32 %v69_v20, %v67_v18  ;;  %v54_v26 = vmax.f32 %v53_v21, 0.0  ;;  %v56_v27 = vmax.f32 %v55_v22, 0.0  ;;  %p139_p9 = pnand %p138_p8, %p132_p5 }
  0x16   :  { %v64_v28 = vadd.f32 %v63_v23, %v60_v17 }
  0x17   :  { %v72_v29 = vmul.f32 %v71_v25, %v70_v24  ;;  %v57_v30 = vmul.f32 %v56_v27, %v54_v26 }
  0x19   :  { %v77_v31 = vadd.f32 1e-07, %v72_v29  ;;  %v65_v32 = vsub.f32 %v64_v28, %v57_v30 }
  0x1b   :  { %107 = vrcp.f32 %v77_v31  ;;  %v73_v33 = vadd.f32 1e-07, %v65_v32  ;;  %v76_v34 = vsub.f32 %v72_v29, %v65_v32 }
  0x1d   :  { %109 = vrcp.f32 %v73_v33 }
  0x28   :  { %v108_v35 = vpop.eup %107 }
  0x29   :  { %v79_v36 = vmul.f32 %v108_v35, %v76_v34 }
  0x2a   :  { %v110_v37 = vpop.eup %109 }
  0x2b   :  { %v75_v38 = vmul.f32 %v110_v37, %v57_v30 }
  0x2d   :  { %v80_v39 = vsub.f32 %v75_v38, %v79_v36 }
  0x2f   :  { %v81_v41 = vsub.f32 1.0, %v80_v39 }
  0x31   :  { %v82_v42 = vmul.f32 %v81_v41, %v48_v40 }
  0x33   :  { %86 = vst [vmem:[#allocation5] sm:$0xff] %v82_v42 }
  0x34   :  { %142 = shalt.err (!%p139_p9)
}
  0x35   :  { %96 = dma.vmem_to_hbm [thread:$0]  %s94_s13, 128, %s176_s1, [#allocation4]  }
  0x36   :  { %153 = dma.done.wait [#allocation4], 128  }
  0x37   :  { %154 = vsyncadd [#allocation4], 4294967168 }
  0x38   :  { %100 = vsyncpa [#allocation3], 1 }
  0x39   :  { %101 = vsyncpa [#allocation4], 1 }

</bundles_post_ra>
